<compile_context>
chip_gen: v7x
topology: tpu7x:2x2x1
jax: 0.10.0
libtpu: 0.0.40
codegen_flags: <defaults>
</compile_context>

<pallas_src>
import jax
import jax.numpy as jnp
from jax.experimental import pallas as pl
from jax.experimental.pallas import tpu as pltpu


def _copy_kernel(x_ref, o_ref):
    # Pure VMEM copy of the current lane-dense block.  No extra vector work:
    # this kernel is HBM-DMA bound on every generation.
    o_ref[...] = x_ref[...]


def _vmem_capacity_bytes():
    """Best-effort per-core VMEM capacity; conservative (v7x) fallback."""
    try:
        info = pltpu.get_tpu_info()
        cap = getattr(info, "vmem_capacity_bytes", None)
        if cap:
            return int(cap)
    except Exception:
        pass
    try:
        kind = jax.devices()[0].device_kind.lower()
        if "v5" in kind or "v6" in kind:
            return 128 << 20
    except Exception:
        pass
    return 64 << 20  # assume v7x's smaller VMEM when unsure


def _sublane_multiple(itemsize):
    # Native sublane packing: 8 rows for 32-bit, 16 for bf16, 32 for int8/fp8.
    return max(8, 32 // max(1, itemsize))


def _pick_lane_width(total, sub):
    """Largest multiple of 128 dividing `total` that still leaves >= sub rows;
    falls back to the largest divisor, or None if total is not a 128-multiple."""
    best = None
    for cand in (8192, 4096, 2048, 1024, 512, 256, 128):
        if total % cand == 0:
            if best is None:
                best = cand
            if total // cand >= sub:
                return cand
    return best


def _pick_block_rows(m, lane, itemsize, sub, target_bytes):
    """Rows per block: ~target_bytes blocks, rounded to the sublane multiple."""
    target_rows = max(sub, target_bytes // (lane * itemsize))
    if m <= target_rows:
        tm = m
    else:
        tm = max(sub, (target_rows // sub) * sub)
    # Give v7x's two TensorCores at least two grid steps on medium/large copies
    # (harmless single-core no-op on v5e/v6e).
    if tm == m and m >= 2 * sub and m * lane * itemsize > (2 << 20):
        tm = max(sub, ((m // 2) // sub) * sub)
    return tm


def identity_copy(x, force_kernel=False):
    """Explicit Pallas copy kernel (only if a kernel boundary is required)."""
    total = x.size
    itemsize = jnp.dtype(x.dtype).itemsize
    if total == 0:
        return x
    # Size gate: below ~1 MiB the fixed pallas_call launch overhead dominates;
    # a kernel is strictly slower than no kernel / an XLA fused copy.
    if not force_kernel and total * itemsize < (1 << 20):
        return x

    vmem_cap = _vmem_capacity_bytes()
    # ~4 MiB blocks on v7x (64 MiB VMEM), ~8 MiB on v5e/v6e (128 MiB VMEM).
    target_bytes = min(8 << 20, vmem_cap // 16)
    # Double-buffered input + output = 4 * block; leave explicit headroom so
    # v5e's 16 MiB default scoped limit never silently drops to single-buffer.
    vmem_limit = int(min(vmem_cap // 2, 4 * target_bytes + (8 << 20)))

    sub = _sublane_multiple(itemsize)
    lane = _pick_lane_width(total, sub)

    if lane is None:
        # Element count not a multiple of 128: bounded (1, chunk) blocks with a
        # masked ragged tail instead of one whole-array block (no VMEM blow-up).
        m, tm = 1, 1
        lane = total
        chunk = max(128, (target_bytes // itemsize // 128) * 128)
        chunk = min(chunk, pl.cdiv(total, 128) * 128)
        flat = x.reshape(1, total)
        grid = (pl.cdiv(total, chunk),)
        in_spec = pl.BlockSpec((1, chunk), lambda i: (0, i))
        out_spec = pl.BlockSpec((1, chunk), lambda i: (0, i))
        out_shape = jax.ShapeDtypeStruct((1, total), x.dtype)
    else:
        m = total // lane
        tm = _pick_block_rows(m, lane, itemsize, sub, target_bytes)
        flat = x.reshape(m, lane)
        grid = (pl.cdiv(m, tm),)
        in_spec = pl.BlockSpec((tm, lane), lambda i: (i, 0))
        out_spec = pl.BlockSpec((tm, lane), lambda i: (i, 0))
        out_shape = jax.ShapeDtypeStruct((m, lane), x.dtype)

    out = pl.pallas_call(
        _copy_kernel,
        out_shape=out_shape,
        grid=grid,
        in_specs=[in_spec],
        out_specs=out_spec,
        compiler_params=pltpu.CompilerParams(
            # Shards the grid across the 2 TensorCores on v7x; no-op on 1-TC chips.
            dimension_semantics=("parallel",),
            vmem_limit_bytes=vmem_limit,
        ),
        cost_estimate=pl.CostEstimate(
            flops=0,
            transcendentals=0,
            bytes_accessed=2 * total * itemsize,
        ),
    )(flat)
    return out.reshape(x.shape)


def identity(x):
    """Identity.forward: y = x.

    Zero required bytes / FLOPs — do not launch a kernel at all.  Use
    `identity_copy` only when a materialized copy / kernel boundary is needed.
    """
    return x


if __name__ == "__main__":
    key = jax.random.PRNGKey(0)
    # Module signature Identity(channel) — channel unused; small NCHW input.
    x = jax.random.normal(key, (2, 4, 16, 16), dtype=jnp.float32)

    y_fast = identity(x)                            # optimal path: no kernel
    y_copy = identity_copy(x, force_kernel=True)    # Pallas lane-dense copy
    jax.block_until_ready((y_fast, y_copy))

    assert y_fast.shape == x.shape and y_fast.dtype == x.dtype
    assert y_copy.shape == x.shape and y_copy.dtype == x.dtype
    assert bool(jnp.all(y_fast == x))
    assert bool(jnp.all(y_copy == x))
    print("KERNEL_OK")
</pallas_src>

<mosaic_0001>
module attributes {stable_mosaic.version = 11 : i64} {
  func.func @_copy_kernel(%arg0: i32, %arg1: memref<8x256xf32, #tpu.memory_space<vmem>>, %arg2: memref<8x256xf32, #tpu.memory_space<vmem>>) attributes {dimension_semantics = [#tpu.dimension_semantics<parallel>], iteration_bounds = array<i64: 1>, scalar_prefetch = 0 : i64, scratch_operands = 0 : i64, tpu.core_type = #tpu.core_type<tc>, window_params = [{transform_indices = @transform_0, window_bounds = array<i64: 8, 256>}, {transform_indices = @transform_1, window_bounds = array<i64: 8, 256>}]} {
    %c0 = arith.constant 0 : index
    %c0_0 = arith.constant 0 : index
    %0 = vector.load %arg1[%c0, %c0_0] : memref<8x256xf32, #tpu.memory_space<vmem>>, vector<8x256xf32>
    %c0_1 = arith.constant 0 : index
    %c0_2 = arith.constant 0 : index
    %1 = vector.load %arg2[%c0_1, %c0_2] : memref<8x256xf32, #tpu.memory_space<vmem>>, vector<8x256xf32>
    tpu.vector_store %arg2[%c0_1, %c0_2], %0 {strides = array<i32>} : memref<8x256xf32, #tpu.memory_space<vmem>>, vector<8x256xf32>,
    return
  }
  func.func @transform_0(%arg0: i32) -> (i32, i32) {
    %c0_i32 = arith.constant 0 : i32
    %c0_i32_0 = arith.constant 0 : i32
    return %arg0, %c0_i32 : i32, i32
  }
  func.func @transform_1(%arg0: i32) -> (i32, i32) {
    %c0_i32 = arith.constant 0 : i32
    %c0_i32_0 = arith.constant 0 : i32
    return %arg0, %c0_i32 : i32, i32
  }
}

</mosaic_0001>

<bundles_post_ra>
// kernel: tpu_custom_call.1
= control target key start
LH: loop header
LB: loop body
LE: loop exit
PB: predicated region body
PF: predicated region fallthrough
CT: control target
= control target key end

     0   :  { %6 = vsyncpa [#allocation3], 0  ;;  %s126_s0 = inlined_call_operand.hbm [shape: f32[8,256], index: 0, kind: input, shape index: {}]   ;;  %s127_s1 = inlined_call_operand.hbm [shape: f32[8,256], index: 1, kind: output, shape index: {}]  }
   0x1   :  { %7 = vsyncpa [#allocation4], 0  ;;  %s90_s6 = smov [#allocation2]   ;;  %s42_s10 = scalar_lea.hbm %s126_s0, 256 }
   0x2   :  { %s14_s7 = sshll.u32 %s90_s6, 4  ;;  %p43_p0 = scmp.ne.s32.totalorder %s126_s0, %s42_s10  ;;  %s15_s7 = int_to_ptr.vmem [resolvable:$true] %s14_s7 }
   0x3   :  { %p46_p1 = scmp.lt.u32.totalorder %s42_s10, %s126_s0 }
   0x5   :  { %p48_p2 = pnand %p46_p1, %p43_p0 }
   0x7   :  { %51 = shalt.err (!%p48_p2)
}
   0x8   :  { %s52_s15 = scalar_lea.vmem %s15_s7, 256  ;;  %p57_p4 = scmp.lt.s32.totalorder %s15_s7, %s15_s7 }
   0x9   :  { %p53_p3 = scmp.ne.s32.totalorder %s15_s7, %s52_s15  ;;  %p58_p5 = scmp.lt.s32.totalorder %s52_s15, %s52_s15 }
   0xb   :  { %p59_p6 = por %p58_p5, %p57_p4 }
   0xd   :  { %p60_p7 = pnand %p59_p6, %p53_p3 }
   0xf   :  { %63 = shalt.err (!%p60_p7)
}
  0x10   :  { %17 = dma.hbm_to_vmem [thread:$0]  %s126_s0, 256, %s15_s7, [#allocation3]  }
  0x11   :  { %86 = dma.done.wait [#allocation3], 256  }
  0x12   :  { %87 = vsyncadd [#allocation3], 4294967040  ;;  %s91_s18 = smov [#allocation5]   ;;  %v21_v0 = vld [vmem:[#allocation2] sm:$0xff]  ;;  %v22_v1 = vld [vmem:[#allocation2 + $0x8] sm:$0xff] }
  0x13   :  { %s31_s19 = sshll.u32 %s91_s18, 4  ;;  %23 = vst [vmem:[#allocation5] sm:$0xff] %v21_v0  ;;  %24 = vst [vmem:[#allocation5 + $0x8] sm:$0xff] %v22_v1  ;;  %s32_s19 = int_to_ptr.vmem [resolvable:$true] %s31_s19 }
  0x14   :  { %s64_s20 = scalar_lea.vmem %s32_s19, 256  ;;  %p69_p9 = scmp.lt.s32.totalorder %s32_s19, %s32_s19 }
  0x15   :  { %p65_p8 = scmp.ne.s32.totalorder %s32_s19, %s64_s20  ;;  %p70_p10 = scmp.lt.s32.totalorder %s64_s20, %s64_s20 }
  0x17   :  { %p71_p11 = por %p70_p10, %p69_p9 }
  0x19   :  { %p72_p12 = pnand %p71_p11, %p65_p8 }
  0x1b   :  { %75 = shalt.err (!%p72_p12)
}
  0x1c   :  { %s76_s0 = scalar_lea.hbm %s127_s1, 256 }
  0x1d   :  { %p77_p13 = scmp.ne.s32.totalorder %s127_s1, %s76_s0  ;;  %p80_p0 = scmp.lt.u32.totalorder %s76_s0, %s127_s1 }
  0x1f   :  { %p82_p1 = pnand %p80_p0, %p77_p13 }
  0x21   :  { %85 = shalt.err (!%p82_p1)
}
  0x22   :  { %34 = dma.vmem_to_hbm [thread:$0]  %s32_s19, 256, %s127_s1, [#allocation4]  }
  0x23   :  { %88 = dma.done.wait [#allocation4], 256  }
  0x24   :  { %89 = vsyncadd [#allocation4], 4294967040 }
  0x25   :  { %38 = vsyncpa [#allocation3], 1 }
  0x26   :  { %39 = vsyncpa [#allocation4], 1 }

</bundles_post_ra>
